<compile_context>
chip_gen: v5e
topology: v5e:2x2
jax: 0.10.0
libtpu: 0.0.40
codegen_flags: <defaults>
</compile_context>

<pallas_src>
import jax
import jax.numpy as jnp
from jax.experimental import pallas as pl
from jax.experimental.pallas import tpu as pltpu


def _scale_kernel(scale_ref, x_ref, o_ref):
    # scale_ref: (1, 1) f32 in SMEM; x_ref / o_ref: (TM, LANE) tiles in VMEM.
    s = scale_ref[0, 0].astype(x_ref.dtype)
    o_ref[...] = (x_ref[...] * s).astype(o_ref.dtype)


def scale_forward(x, scale):
    """x: any-shaped array (e.g. NCHW), scale: shape (1,) learnable parameter."""
    orig_shape = x.shape
    orig_dtype = x.dtype
    n = x.size
    itemsize = jnp.dtype(orig_dtype).itemsize

    flat = x.reshape(-1)

    # Pick a lane-dense last dim (large multiple of 128). Pad only if nothing
    # divides the element count.
    lane = None
    for cand in (1024, 512, 256, 128):
        if n % cand == 0:
            lane = cand
            break
    if lane is None:
        lane = 1024
        padded_n = pl.cdiv(n, lane) * lane
        flat = jnp.pad(flat, (0, padded_n - n))
    padded_n = flat.size
    rows = padded_n // lane
    x2d = flat.reshape(rows, lane)

    # Row tile: ~2 MiB per tile (fits v5e's 16 MiB default scoped VMEM with
    # 2 arrays x 2 double-buffers, and stays far under v7x's 64 MiB physical).
    target_tile_bytes = 2 * 1024 * 1024
    tm = max(8, (target_tile_bytes // (lane * itemsize)) // 8 * 8)
    tm = min(tm, rows)  # full-extent block if the array is small
    grid = (pl.cdiv(rows, tm),)

    # Scalar parameter lives in SMEM as a (1, 1) block.
    scale_smem = scale.reshape(1, 1).astype(jnp.float32)

    out = pl.pallas_call(
        _scale_kernel,
        out_shape=jax.ShapeDtypeStruct((rows, lane), orig_dtype),
        grid_spec=pltpu.PrefetchScalarGridSpec(
            num_scalar_prefetch=0,
            grid=grid,
            in_specs=[
                pl.BlockSpec((1, 1), lambda i: (0, 0),
                             memory_space=pltpu.SMEM),
                pl.BlockSpec((tm, lane), lambda i: (i, 0)),
            ],
            out_specs=pl.BlockSpec((tm, lane), lambda i: (i, 0)),
        ),
        compiler_params=pltpu.CompilerParams(
            dimension_semantics=("parallel",),
            vmem_limit_bytes=32 * 1024 * 1024,
        ),
        cost_estimate=pl.CostEstimate(
            flops=int(n),
            transcendentals=0,
            bytes_accessed=int(2 * n * itemsize),
        ),
    )(scale_smem, x2d)

    out_flat = out.reshape(-1)
    if padded_n != n:
        out_flat = out_flat[:n]
    return out_flat.reshape(orig_shape)


class ScalePallas:
    """JAX/Pallas equivalent of tridet Scale(nn.Module)."""

    def __init__(self, init_value=1.0):
        # Matches nn.Parameter(torch.FloatTensor([init_value]))
        self.scale = jnp.array([init_value], dtype=jnp.float32)

    def __call__(self, x):
        return scale_forward(x, self.scale)


if __name__ == "__main__":
    key = jax.random.PRNGKey(0)
    # NCHW input, small shapes.
    x = jax.random.normal(key, (2, 4, 16, 16), dtype=jnp.float32)

    module = ScalePallas(init_value=1.5)
    out = module(x)
    out = jax.block_until_ready(out)

    # Reference check against plain JAX broadcast multiply.
    ref = x * module.scale[0]
    assert out.shape == x.shape
    assert out.dtype == x.dtype
    assert jnp.allclose(out, ref, atol=1e-6, rtol=1e-6)

    # Extra check: a shape whose trailing dims are not multiples of 128
    # (exercises the lane-selection / padding path).
    x2 = jax.random.normal(jax.random.PRNGKey(1), (3, 5, 10, 10), dtype=jnp.float32)
    out2 = jax.block_until_ready(module(x2))
    ref2 = x2 * module.scale[0]
    assert out2.shape == x2.shape
    assert jnp.allclose(out2, ref2, atol=1e-6, rtol=1e-6)

    print("KERNEL_OK")
</pallas_src>

<mosaic_0001>
module attributes {stable_mosaic.version = 11 : i64} {
  func.func @_scale_kernel(%arg0: i32, %arg1: memref<1x1xf32, #tpu.memory_space<smem>>, %arg2: memref<2x1024xf32, #tpu.memory_space<vmem>>, %arg3: memref<2x1024xf32, #tpu.memory_space<vmem>>) attributes {dimension_semantics = [#tpu.dimension_semantics<parallel>], iteration_bounds = array<i64: 1>, scalar_prefetch = 0 : i64, scratch_operands = 0 : i64, tpu.core_type = #tpu.core_type<tc>, window_params = [{transform_indices = @transform_0, window_bounds = array<i64: 1, 1>}, {transform_indices = @transform_1, window_bounds = array<i64: 2, 1024>}, {transform_indices = @transform_2, window_bounds = array<i64: 2, 1024>}]} {
    %c0 = arith.constant 0 : index
    %c0_0 = arith.constant 0 : index
    %0 = memref.load %arg1[%c0, %c0_0] : memref<1x1xf32, #tpu.memory_space<smem>>
    %c0_1 = arith.constant 0 : index
    %c0_2 = arith.constant 0 : index
    %1 = vector.load %arg2[%c0_1, %c0_2] : memref<2x1024xf32, #tpu.memory_space<vmem>>, vector<2x1024xf32>
    %2 = vector.broadcast %0 : f32 to vector<2x1024xf32>
    %3 = arith.mulf %1, %2 : vector<2x1024xf32>
    %c0_3 = arith.constant 0 : index
    %c0_4 = arith.constant 0 : index
    %4 = vector.load %arg3[%c0_3, %c0_4] : memref<2x1024xf32, #tpu.memory_space<vmem>>, vector<2x1024xf32>
    tpu.vector_store %arg3[%c0_3, %c0_4], %3 {strides = array<i32>} : memref<2x1024xf32, #tpu.memory_space<vmem>>, vector<2x1024xf32>,
    return
  }
  func.func @transform_0(%arg0: i32) -> (i32, i32) {
    %c0_i32 = arith.constant 0 : i32
    %c0_i32_0 = arith.constant 0 : i32
    %c0_i32_1 = arith.constant 0 : i32
    return %c0_i32, %c0_i32_0 : i32, i32
  }
  func.func @transform_1(%arg0: i32) -> (i32, i32) {
    %c0_i32 = arith.constant 0 : i32
    %c0_i32_0 = arith.constant 0 : i32
    return %arg0, %c0_i32 : i32, i32
  }
  func.func @transform_2(%arg0: i32) -> (i32, i32) {
    %c0_i32 = arith.constant 0 : i32
    %c0_i32_0 = arith.constant 0 : i32
    return %arg0, %c0_i32 : i32, i32
  }
}

</mosaic_0001>

<bundles_post_ra>
// kernel: tpu_custom_call.1
= control target key start
LH: loop header
LB: loop body
LE: loop exit
PB: predicated region body
PF: predicated region fallthrough
CT: control target
= control target key end

     0   :  { %8 = vsyncpa [#allocation4], 0  ;;  %s132_s0 = inlined_call_operand.<no memory space> [shape: f32[1,1], index: 0, kind: input, shape index: {}]   ;;  %s133_s1 = inlined_call_operand.hbm [shape: f32[2,1024], index: 1, kind: input, shape index: {}]   ;;  %s134_s2 = inlined_call_operand.hbm [shape: f32[2,1024], index: 2, kind: output, shape index: {}]  }
   0x1   :  { %9 = vsyncpa [#allocation5], 0  ;;  %s17_s11 = sshll.u32 %s133_s1, 4  ;;  %s106_s12 = smov [#allocation3]   ;;  %s18_s11 = int_to_ptr.hbm [resolvable:$true] %s17_s11 }
   0x2   :  { %s19_s13 = sshll.u32 %s106_s12, 4  ;;  %s20_s13 = int_to_ptr.vmem [resolvable:$true] %s19_s13 }
   0x3   :  { %22 = dma.hbm_to_vmem [thread:$0]  %s18_s11, 256, %s20_s13, [#allocation4]  }
   0x4   :  { %102 = dma.done.wait [#allocation4], 256  }
   0x5   :  { %103 = vsyncadd [#allocation4], 4294967040  ;;  %v30_v0 = vstv %s132_s0  ;;  %s107_s16 = smov [#allocation6]   ;;  %s42_s20 = sshll.u32 %s134_s2, 4  ;;  %v28_v1 = vld [vmem:[#allocation3] sm:$0xff]  ;;  %v29_v2 = vld [vmem:[#allocation3 + $0x8] sm:$0xff]  ;;  %s43_s20 = int_to_ptr.hbm [resolvable:$true] %s42_s20 }
   0x6   :  { %s40_s17 = sshll.u32 %s107_s16, 4  ;;  %v31_v3 = vmul.f32 %v30_v0, %v28_v1  ;;  %v32_v4 = vmul.f32 %v30_v0, %v29_v2  ;;  %s41_s17 = int_to_ptr.vmem [resolvable:$true] %s40_s17 }
   0x8   :  { %33 = vst [vmem:[#allocation6] sm:$0xff] %v31_v3 }
   0x9   :  { %34 = vst [vmem:[#allocation6 + $0x8] sm:$0xff] %v32_v4 }
   0xa   :  { %45 = dma.vmem_to_hbm [thread:$0]  %s41_s17, 256, %s43_s20, [#allocation5]  }
   0xb   :  { %104 = dma.done.wait [#allocation5], 256  }
   0xc   :  { %105 = vsyncadd [#allocation5], 4294967040 }
   0xd   :  { %50 = vsyncpa [#allocation4], 1 }
   0xe   :  { %51 = vsyncpa [#allocation5], 1 }

</bundles_post_ra>
